<compile_context>
chip_gen: v7x
topology: tpu7x:2x2x1
jax: 0.10.0
libtpu: 0.0.40
codegen_flags: <defaults>
</compile_context>

<pallas_src>
import functools

import jax
import jax.numpy as jnp
from jax.experimental import pallas as pl
from jax.experimental.pallas import tpu as pltpu


def _policy_kernel(x_ref, w1_ref, b1_ref, w2_ref, b2_ref, o_ref):
    # fc1 + ReLU: bf16 operands into the MXU, f32 accumulation, f32 bias add.
    h = jnp.dot(x_ref[...], w1_ref[...], preferred_element_type=jnp.float32) + b1_ref[...]
    h = jnp.maximum(h, 0.0).astype(w2_ref.dtype)  # bf16 before the second matmul

    # fc2 (bf16 x bf16 -> f32 accum) + f32 bias. Padded output lanes carry a -1e30
    # bias so they vanish under softmax.
    logits = jnp.dot(h, w2_ref[...], preferred_element_type=jnp.float32) + b2_ref[...]

    # Numerically-stable softmax along the last dim (matches F.softmax(x, dim=-1)).
    m = jnp.max(logits, axis=-1, keepdims=True)
    e = jnp.exp(logits - m)
    denom = jnp.sum(e, axis=-1, keepdims=True)
    # Reciprocal goes to the EUP (separate VLIW slot) instead of VALU divides.
    o_ref[...] = (e * pl.reciprocal(denom, approx=True)).astype(o_ref.dtype)


def _round_up(x, m):
    return ((x + m - 1) // m) * m


@functools.partial(jax.jit, static_argnames=("block_b",))
def policy_network_forward(x, w1, b1, w2, b2, *, block_b=256):
    """x: (B, input_size) f32 -> probs: (B, output_size) f32.

    w1: (input_size, hidden), b1: (1, hidden), w2: (hidden, output_size), b2: (1, output_size).
    Handles arbitrary B / feature sizes by padding to TPU-friendly shapes internally.
    """
    B, in_dim = x.shape
    hid = w1.shape[1]
    out_dim = w2.shape[1]

    # --- pad feature dims to the 128-lane width, batch to the block size (mult of 8) ---
    in_p = _round_up(in_dim, 128)
    hid_p = _round_up(hid, 128)
    out_p = _round_up(out_dim, 128)

    bb = _round_up(min(block_b, _round_up(B, 8)), 8)
    B_p = _round_up(_round_up(B, 8), bb)

    NEG = jnp.float32(-1e30)

    # bf16 operands for the MXU; biases stay f32 (added to the f32 accumulator).
    x_p = jnp.zeros((B_p, in_p), jnp.bfloat16).at[:B, :in_dim].set(x.astype(jnp.bfloat16))
    w1_p = jnp.zeros((in_p, hid_p), jnp.bfloat16).at[:in_dim, :hid].set(w1.astype(jnp.bfloat16))
    b1_p = jnp.zeros((1, hid_p), jnp.float32).at[:, :hid].set(b1.astype(jnp.float32))
    w2_p = jnp.zeros((hid_p, out_p), jnp.bfloat16).at[:hid, :out_dim].set(w2.astype(jnp.bfloat16))
    # Padded output lanes: bias = -1e30 -> exp underflows to 0 -> softmax ignores them.
    b2_p = jnp.full((1, out_p), NEG, jnp.float32).at[:, :out_dim].set(b2.astype(jnp.float32))

    grid = (B_p // bb,)

    probs_p = pl.pallas_call(
        _policy_kernel,
        out_shape=jax.ShapeDtypeStruct((B_p, out_p), jnp.float32),
        grid_spec=pl.GridSpec(
            grid=grid,
            in_specs=[
                pl.BlockSpec((bb, in_p), lambda i: (i, 0)),      # x tile (batch-sliced)
                pl.BlockSpec((in_p, hid_p), lambda i: (0, 0)),   # w1 (resident)
                pl.BlockSpec((1, hid_p), lambda i: (0, 0)),      # b1
                pl.BlockSpec((hid_p, out_p), lambda i: (0, 0)),  # w2 (resident)
                pl.BlockSpec((1, out_p), lambda i: (0, 0)),      # b2
            ],
            out_specs=pl.BlockSpec((bb, out_p), lambda i: (i, 0)),
        ),
        compiler_params=pltpu.CompilerParams(
            dimension_semantics=("parallel",),  # batch axis shards across TCs on v7x
        ),
    )(x_p, w1_p, b1_p, w2_p, b2_p)

    # Drop batch / output-lane padding.
    return probs_p[:B, :out_dim]


def init_params(key, input_size, hidden_size, output_size):
    """Deterministic init mirroring nn.Linear's U(-1/sqrt(fan_in), 1/sqrt(fan_in))."""
    k1, k2, k3, k4 = jax.random.split(key, 4)
    bnd1 = 1.0 / jnp.sqrt(input_size)
    bnd2 = 1.0 / jnp.sqrt(hidden_size)
    w1 = jax.random.uniform(k1, (input_size, hidden_size), jnp.float32, -bnd1, bnd1)
    b1 = jax.random.uniform(k2, (1, hidden_size), jnp.float32, -bnd1, bnd1)
    w2 = jax.random.uniform(k3, (hidden_size, output_size), jnp.float32, -bnd2, bnd2)
    b2 = jax.random.uniform(k4, (1, output_size), jnp.float32, -bnd2, bnd2)
    return w1, b1, w2, b2


if __name__ == "__main__":
    # Shapes consistent with the module: input_size = output_size = len(test_cases)
    # (pick 100, deliberately not a multiple of 128 to exercise lane padding),
    # hidden_size (1024 in the script) shrunk to 256 for the demo.
    # batch=512 with block_b=256 -> grid=(2,), so both v7x TensorCores get work.
    batch, input_size, hidden_size, output_size = 512, 100, 256, 100

    key = jax.random.PRNGKey(0)
    kx, kp = jax.random.split(key)
    x = jax.random.normal(kx, (batch, input_size), jnp.float32)
    w1, b1, w2, b2 = init_params(kp, input_size, hidden_size, output_size)

    probs = policy_network_forward(x, w1, b1, w2, b2)
    jax.block_until_ready(probs)

    # Reference in plain JAX (f32). Kernel uses bf16 MXU operands + approx reciprocal,
    # so compare with a modest tolerance.
    h_ref = jnp.maximum(x @ w1 + b1, 0.0)
    ref = jax.nn.softmax(h_ref @ w2 + b2, axis=-1)

    assert probs.shape == (batch, output_size)
    assert bool(jnp.all(jnp.isfinite(probs)))
    assert jnp.allclose(jnp.sum(probs, axis=-1), 1.0, atol=5e-3)
    assert jnp.allclose(probs, ref, atol=2e-2)

    print("KERNEL_OK")
</pallas_src>

<mosaic_0001>
module attributes {stable_mosaic.version = 11 : i64} {
  func.func @_policy_kernel(%arg0: i32, %arg1: memref<256x128xbf16, #tpu.memory_space<vmem>>, %arg2: memref<128x256xbf16, #tpu.memory_space<vmem>>, %arg3: memref<1x256xf32, #tpu.memory_space<vmem>>, %arg4: memref<256x128xbf16, #tpu.memory_space<vmem>>, %arg5: memref<1x128xf32, #tpu.memory_space<vmem>>, %arg6: memref<256x128xf32, #tpu.memory_space<vmem>>) attributes {dimension_semantics = [#tpu.dimension_semantics<parallel>], iteration_bounds = array<i64: 2>, scalar_prefetch = 0 : i64, scratch_operands = 0 : i64, tpu.core_type = #tpu.core_type<tc>, window_params = [{transform_indices = @transform_0, window_bounds = array<i64: 256, 128>}, {pipeline_mode = #tpu.pipeline_mode<synchronous>, transform_indices = @transform_1, window_bounds = array<i64: 128, 256>}, {pipeline_mode = #tpu.pipeline_mode<synchronous>, transform_indices = @transform_2, window_bounds = array<i64: 1, 256>}, {pipeline_mode = #tpu.pipeline_mode<synchronous>, transform_indices = @transform_3, window_bounds = array<i64: 256, 128>}, {pipeline_mode = #tpu.pipeline_mode<synchronous>, transform_indices = @transform_4, window_bounds = array<i64: 1, 128>}, {transform_indices = @transform_5, window_bounds = array<i64: 256, 128>}]} {
    %c0 = arith.constant 0 : index
    %c0_0 = arith.constant 0 : index
    %0 = vector.load %arg1[%c0, %c0_0] : memref<256x128xbf16, #tpu.memory_space<vmem>>, vector<256x128xbf16>
    %c0_1 = arith.constant 0 : index
    %c0_2 = arith.constant 0 : index
    %1 = vector.load %arg2[%c0_1, %c0_2] : memref<128x256xbf16, #tpu.memory_space<vmem>>, vector<128x256xbf16>
    %cst = arith.constant dense<0.000000e+00> : vector<256x256xf32>
    %2 = tpu.matmul %0, %1, %cst {dimension_numbers = #tpu.dot_dimension_numbers<[1], [0], [0], [1], [0, 0, 1, 1], [], []>} : vector<256x128xbf16>, vector<128x256xbf16>, vector<256x256xf32> -> vector<256x256xf32>
    %c0_3 = arith.constant 0 : index
    %c0_4 = arith.constant 0 : index
    %3 = vector.load %arg3[%c0_3, %c0_4] : memref<1x256xf32, #tpu.memory_space<vmem>>, vector<1x256xf32>
    %4 = vector.broadcast %3 : vector<1x256xf32> to vector<256x256xf32>
    %5 = arith.addf %2, %4 : vector<256x256xf32>
    %cst_5 = arith.constant 0.000000e+00 : f32
    %6 = vector.broadcast %cst_5 : f32 to vector<256x256xf32>
    %7 = arith.maximumf %5, %6 : vector<256x256xf32>
    %8 = arith.truncf %7 : vector<256x256xf32> to vector<256x256xbf16>
    %c0_6 = arith.constant 0 : index
    %c0_7 = arith.constant 0 : index
    %9 = vector.load %arg4[%c0_6, %c0_7] : memref<256x128xbf16, #tpu.memory_space<vmem>>, vector<256x128xbf16>
    %cst_8 = arith.constant dense<0.000000e+00> : vector<256x128xf32>
    %10 = tpu.matmul %8, %9, %cst_8 {dimension_numbers = #tpu.dot_dimension_numbers<[1], [0], [0], [1], [0, 0, 1, 1], [], []>} : vector<256x256xbf16>, vector<256x128xbf16>, vector<256x128xf32> -> vector<256x128xf32>
    %c0_9 = arith.constant 0 : index
    %c0_10 = arith.constant 0 : index
    %11 = vector.load %arg5[%c0_9, %c0_10] : memref<1x128xf32, #tpu.memory_space<vmem>>, vector<1x128xf32>
    %12 = vector.broadcast %11 : vector<1x128xf32> to vector<256x128xf32>
    %13 = arith.addf %10, %12 : vector<256x128xf32>
    %cst_11 = arith.constant dense<0xFF800000> : vector<256xf32>
    %14 = vector.multi_reduction <maximumf>, %13, %cst_11 [1] : vector<256x128xf32> to vector<256xf32>
    %15 = vector.shape_cast %14 : vector<256xf32> to vector<256x1xf32>
    %16 = vector.broadcast %15 : vector<256x1xf32> to vector<256x128xf32>
    %17 = arith.subf %13, %16 : vector<256x128xf32>
    %18 = math.exp %17 : vector<256x128xf32>
    %cst_12 = arith.constant dense<0.000000e+00> : vector<256xf32>
    %19 = vector.multi_reduction <add>, %18, %cst_12 [1] : vector<256x128xf32> to vector<256xf32>
    %20 = vector.shape_cast %19 : vector<256xf32> to vector<256x1xf32>
    %21 = tpu.reciprocal %20 {approx = true} : vector<256x1xf32> -> vector<256x1xf32>
    %22 = vector.broadcast %21 : vector<256x1xf32> to vector<256x128xf32>
    %23 = arith.mulf %18, %22 : vector<256x128xf32>
    %c0_13 = arith.constant 0 : index
    %c0_14 = arith.constant 0 : index
    %24 = vector.load %arg6[%c0_13, %c0_14] : memref<256x128xf32, #tpu.memory_space<vmem>>, vector<256x128xf32>
    tpu.vector_store %arg6[%c0_13, %c0_14], %23 {strides = array<i32>} : memref<256x128xf32, #tpu.memory_space<vmem>>, vector<256x128xf32>,
    return
  }
  func.func @transform_0(%arg0: i32) -> (i32, i32) {
    %c0_i32 = arith.constant 0 : i32
    %c0_i32_0 = arith.constant 0 : i32
    return %arg0, %c0_i32 : i32, i32
  }
  func.func @transform_1(%arg0: i32) -> (i32, i32) {
    %c0_i32 = arith.constant 0 : i32
    %c0_i32_0 = arith.constant 0 : i32
    %c0_i32_1 = arith.constant 0 : i32
    return %c0_i32, %c0_i32_0 : i32, i32
  }
  func.func @transform_2(%arg0: i32) -> (i32, i32) {
    %c0_i32 = arith.constant 0 : i32
    %c0_i32_0 = arith.constant 0 : i32
    %c0_i32_1 = arith.constant 0 : i32
    return %c0_i32, %c0_i32_0 : i32, i32
  }
  func.func @transform_3(%arg0: i32) -> (i32, i32) {
    %c0_i32 = arith.constant 0 : i32
    %c0_i32_0 = arith.constant 0 : i32
    %c0_i32_1 = arith.constant 0 : i32
    return %c0_i32, %c0_i32_0 : i32, i32
  }
  func.func @transform_4(%arg0: i32) -> (i32, i32) {
    %c0_i32 = arith.constant 0 : i32
    %c0_i32_0 = arith.constant 0 : i32
    %c0_i32_1 = arith.constant 0 : i32
    return %c0_i32, %c0_i32_0 : i32, i32
  }
  func.func @transform_5(%arg0: i32) -> (i32, i32) {
    %c0_i32 = arith.constant 0 : i32
    %c0_i32_0 = arith.constant 0 : i32
    return %arg0, %c0_i32 : i32, i32
  }
}

</mosaic_0001>

<bundles_post_ra>
// kernel: policy_network_forward.1
= control target key start
LH: loop header
LB: loop body
LE: loop exit
PB: predicated region body
PF: predicated region fallthrough
CT: control target
= control target key end

     0   :  { %s1830_s18 = smov 0   ;;  %s2379_s0 = inlined_call_operand.vmem [shape: bf16[512,128], index: 0, kind: input, shape index: {}]   ;;  %s2380_s1 = inlined_call_operand.vmem [shape: bf16[128,256], index: 1, kind: input, shape index: {}]   ;;  %s2381_s2 = inlined_call_operand.vmem [shape: f32[1,256], index: 2, kind: input, shape index: {}]   ;;  %s2382_s3 = inlined_call_operand.vmem [shape: bf16[256,128], index: 3, kind: input, shape index: {}]   ;;  %s2383_s4 = inlined_call_operand.vmem [shape: f32[1,128], index: 4, kind: input, shape index: {}]   ;;  %s2384_s5 = inlined_call_operand.vmem [shape: f32[512,128], index: 5, kind: output, shape index: {}]  }
   0x1 LB: > { %s1426_s19 = sadd.s32 4294967295, %s1797_s18   ;;  %p1430_p0 = scmp.ge.s32.totalorder %s1797_s18, 1  ;;  %s1797_s18 = sphi %s1830_s18, %s15_s18  }
   0x2   : > { %p188_p1 = scmp.lt.s32.totalorder %s1797_s18, 3 }
   0x4   : > { %p189_p2 = pnand %p1430_p0, %p188_p1 }
   0x5   : > { %v1607_v0 = vld [vmem:[%s2380_s1 + $0x4] ss:$8 sps:$4 sm:$0xff] (!%p189_p2)   ;;  %s1431_s22 = sshll.u32 (!%p189_p2), %s1426_s19, 5  ;;  %v1609_v1 = vld [vmem:[%s2380_s1] ss:$8 sps:$4 sm:$0xff] (!%p189_p2)   ;;  %v1799_v2 = vmov (!%p189_p2), 0   ;;  %v279_v49 = vlaneseq (!%p189_p2) }
   0x6   : > { %192 = sbr.rel (%p189_p2) target bundleno = 912 (0x390), region = 40  ;;  %497 = vmatprep.mubr.bf16.mxu0 (!%p189_p2), %v1799_v2  ;;  %p217_p3 = scmp.lt.s32.totalorder (!%p189_p2), %s1431_s22, 63  ;;  %465 = vmatprep.subr.bf16.mxu0 (!%p189_p2), %v1607_v0  ;;  %v1610_v3 = vld [vmem:[%s2380_s1 + $0x14] ss:$8 sps:$4 sm:$0xff] (!%p189_p2)   ;;  %v1612_v4 = vld [vmem:[%s2380_s1 + $0x10] ss:$8 sps:$4 sm:$0xff] (!%p189_p2)  }
   0x7   : > { %466 = vmatpush1.bf16.msra.mxu0 (!%p189_p2), %v1609_v1  ;;  %v1613_v5 = vld [vmem:[%s2380_s1 + $0x24] ss:$8 sps:$4 sm:$0xff] (!%p189_p2)   ;;  %v1615_v6 = vld [vmem:[%s2380_s1 + $0x20] ss:$8 sps:$4 sm:$0xff] (!%p189_p2)   ;;  %v1616_v7 = vld [vmem:[%s2380_s1 + $0x34] ss:$8 sps:$4 sm:$0xff] (!%p189_p2)  }
   0x8   : > { %467 = vmatprep.subr.bf16.mxu0 (!%p189_p2), %v1610_v3  ;;  %v1618_v8 = vld [vmem:[%s2380_s1 + $0x30] ss:$8 sps:$4 sm:$0xff] (!%p189_p2)   ;;  %v1619_v9 = vld [vmem:[%s2380_s1 + $0x44] ss:$8 sps:$4 sm:$0xff] (!%p189_p2)   ;;  %v1621_v10 = vld [vmem:[%s2380_s1 + $0x40] ss:$8 sps:$4 sm:$0xff] (!%p189_p2)  }
   0x9   : > { %v1622_v11 = vld [vmem:[%s2380_s1 + $0x54] ss:$8 sps:$4 sm:$0xff] (!%p189_p2)   ;;  %v1624_v12 = vld [vmem:[%s2380_s1 + $0x50] ss:$8 sps:$4 sm:$0xff] (!%p189_p2)   ;;  %v1625_v13 = vld [vmem:[%s2380_s1 + $0x64] ss:$8 sps:$4 sm:$0xff] (!%p189_p2)  }
   0xa   : > { %v1627_v14 = vld [vmem:[%s2380_s1 + $0x60] ss:$8 sps:$4 sm:$0xff] (!%p189_p2)   ;;  %v1628_v15 = vld [vmem:[%s2380_s1 + $0x74] ss:$8 sps:$4 sm:$0xff] (!%p189_p2)   ;;  %v1630_v16 = vld [vmem:[%s2380_s1 + $0x70] ss:$8 sps:$4 sm:$0xff] (!%p189_p2)  }
   0xb   : > { %468 = vmatpush1.bf16.msra.mxu0 (!%p189_p2), %v1612_v4  ;;  %v1647_v17 = vld [vmem:[%s2382_s3 + $0x40] sm:$0xff] (!%p189_p2)   ;;  %v1649_v20 = vld [vmem:[%s2382_s3 + $0x48] sm:$0xff] (!%p189_p2)   ;;  %v1651_v22 = vld [vmem:[%s2382_s3 + $0x50] sm:$0xff] (!%p189_p2)   ;;  %v280_v50 = vshrl.u32 (!%p189_p2), %v279_v49, 7 }
   0xc   : > { %469 = vmatprep.subr.bf16.mxu0 (!%p189_p2), %v1613_v5  ;;  %v1648_v19 = vld [vmem:[%s2382_s3] sm:$0xff] (!%p189_p2)   ;;  %1486 = vmatprep.subr.bf16.mxu1 (!%p189_p2), %v1647_v17  ;;  %v1650_v21 = vld [vmem:[%s2382_s3 + $0x8] sm:$0xff] (!%p189_p2)   ;;  %v1652_v23 = vld [vmem:[%s2382_s3 + $0x10] sm:$0xff] (!%p189_p2)  }
   0xd   : > { %s2386_s22 = smov (!%p217_p3, %s1431_s22), 63  ;;  %1487 = vmatpush3.bf16.msra.mxu1 %v1648_v19  ;;  %v1653_v24 = vld [vmem:[%s2382_s3 + $0x58] sm:$0xff]   ;;  %v1655_v27 = vld [vmem:[%s2382_s3 + $0x60] sm:$0xff]   ;;  %v1657_v29 = vld [vmem:[%s2382_s3 + $0x68] sm:$0xff]   ;;  %v281_v51 = vsub.s32 0, %v280_v50  ;;  %v285_v53 = vsub.s32 1, %v280_v50 }
   0xe   : > { %s1432_s6 = sshll.u32 %s2386_s22, 2  ;;  %1488 = vmatprep.subr.bf16.mxu1 %v1649_v20  ;;  %v1654_v26 = vld [vmem:[%s2382_s3 + $0x18] sm:$0xff]   ;;  %v1656_v28 = vld [vmem:[%s2382_s3 + $0x20] sm:$0xff]   ;;  %v1658_v39 = vld [vmem:[%s2382_s3 + $0x28] sm:$0xff]   ;;  %s1434_s25 = sshll.u32 %s2386_s22, 3 }
   0xf   : > { %s1866_s13 = scalar_lea.vmem %s2379_s0, %s1432_s6  ;;  %470 = vmatpush1.bf16.msra.mxu0 %v1615_v6  ;;  %v1659_v41 = vld [vmem:[%s2382_s3 + $0x70] sm:$0xff]   ;;  %v1661_v43 = vld [vmem:[%s2382_s3 + $0x78] sm:$0xff]   ;;  %v277_v52 = vld [vmem:[%s2381_s2] sm:$0x3]  ;;  %s2310_s28 = scalar_lea.vmem %s2384_s5, %s1434_s25 }
  0x10   : > { %471 = vmatprep.subr.bf16.mxu0 %v1616_v7  ;;  %v1631_v18 = vld [vmem:[%s1866_s13] sm:$0xff]   ;;  %v1632_v25 = vld [vmem:[%s1866_s13 + $0x8] sm:$0xff]   ;;  %v1633_v30 = vld [vmem:[%s1866_s13 + $0x10] sm:$0xff]   ;;  %v1977_v54 = vrot.slane %v277_v52, %v281_v51  ;;  %v1979_v55 = vrot.slane %v277_v52, %v285_v53 }
  0x11   : > { %1489 = vmatpush3.bf16.msra.mxu1 %v1650_v21  ;;  %v1634_v31 = vld [vmem:[%s1866_s13 + $0x18] sm:$0xff]   ;;  %v1635_v32 = vld [vmem:[%s1866_s13 + $0x20] sm:$0xff]   ;;  %v1636_v33 = vld [vmem:[%s1866_s13 + $0x28] sm:$0xff]  }
  0x12   : > { %1490 = vmatprep.subr.bf16.mxu1 %v1651_v22  ;;  %v1637_v34 = vld [vmem:[%s1866_s13 + $0x30] sm:$0xff]   ;;  %v1638_v35 = vld [vmem:[%s1866_s13 + $0x38] sm:$0xff]   ;;  %v1639_v36 = vld [vmem:[%s1866_s13 + $0x40] sm:$0xff]  }
  0x13   : > { %472 = vmatpush1.bf16.msra.mxu0 %v1618_v8  ;;  %v1640_v37 = vld [vmem:[%s1866_s13 + $0x48] sm:$0xff]   ;;  %v1641_v38 = vld [vmem:[%s1866_s13 + $0x50] sm:$0xff]   ;;  %v1642_v40 = vld [vmem:[%s1866_s13 + $0x58] sm:$0xff]  }
  0x14   : > { %473 = vmatprep.subr.bf16.mxu0 %v1619_v9  ;;  %v1660_v42 = vld [vmem:[%s2382_s3 + $0x30] sm:$0xff]   ;;  %v1662_v44 = vld [vmem:[%s2382_s3 + $0x38] sm:$0xff]   ;;  %v1643_v45 = vld [vmem:[%s1866_s13 + $0x60] sm:$0xff]  }
  0x15   : > { %1491 = vmatpush3.bf16.msra.mxu1 %v1652_v23  ;;  %v1644_v46 = vld [vmem:[%s1866_s13 + $0x68] sm:$0xff]   ;;  %v1645_v47 = vld [vmem:[%s1866_s13 + $0x70] sm:$0xff]   ;;  %v1646_v48 = vld [vmem:[%s1866_s13 + $0x78] sm:$0xff]  }
  0x16   : > { %1492 = vmatprep.subr.bf16.mxu1 %v1653_v24 }
  0x17   : > { %474 = vmatpush1.bf16.msra.mxu0 %v1621_v10 }
  0x18   : > { %475 = vmatprep.subr.bf16.mxu0 %v1622_v11 }
  0x19   : > { %1493 = vmatpush3.bf16.msra.mxu1 %v1654_v26 }
  0x1a   : > { %1494 = vmatprep.subr.bf16.mxu1 %v1655_v27 }
  0x1b   : > { %476 = vmatpush1.bf16.msra.mxu0 %v1624_v12 }
  0x1c   : > { %477 = vmatprep.subr.bf16.mxu0 %v1625_v13 }
  0x1d   : > { %1495 = vmatpush3.bf16.msra.mxu1 %v1656_v28 }
  0x1e   : > { %1496 = vmatprep.subr.bf16.mxu1 %v1657_v29 }
  0x1f   : > { %478 = vmatpush1.bf16.msra.mxu0 %v1627_v14 }
  0x20   : > { %479 = vmatprep.subr.bf16.mxu0 %v1628_v15 }
  0x21   : > { %1497 = vmatpush3.bf16.msra.mxu1 %v1658_v39 }
  0x22   : > { %1498 = vmatprep.subr.bf16.mxu1 %v1659_v41 }
  0x23   : > { %480 = vmatpush1.bf16.msra.mxu0 %v1630_v16 }
  0x25   : > { %1499 = vmatpush3.bf16.msra.mxu1 %v1660_v42 }
  0x26   : > { %498 = vmatmul.mubr.bf16.vlgmr.msra.gmra.mrb[0].mxu0 %v1631_v18  ;;  %1500 = vmatprep.subr.bf16.mxu1 %v1661_v43 }
  0x27   : > { %507 = vmatprep.mubr.bf16.mxu0 %v1799_v2 }
  0x29   : > { %1501 = vmatpush3.bf16.msra.mxu1 %v1662_v44 }
  0x2e   : > { %508 = vmatmul.mubr.bf16.gmra.mrb[4].mxu0 %v1632_v25 }
  0x2f   : > { %517 = vmatprep.mubr.bf16.mxu0 %v1799_v2 }
  0x36   : > { %518 = vmatmul.mubr.bf16.gmra.mrb[8].mxu0 %v1633_v30 }
  0x37   : > { %527 = vmatprep.mubr.bf16.mxu0 %v1799_v2 }
  0x3e   : > { %528 = vmatmul.mubr.bf16.gmra.mrb[12].mxu0 %v1634_v31 }
  0x3f   : > { %537 = vmatprep.mubr.bf16.mxu0 %v1799_v2 }
  0x46   : > { %538 = vmatmul.mubr.bf16.gmra.mrb[16].mxu0 %v1635_v32 }
  0x47   : > { %547 = vmatprep.mubr.bf16.mxu0 %v1799_v2 }
  0x4e   : > { %548 = vmatmul.mubr.bf16.gmra.mrb[20].mxu0 %v1636_v33 }
  0x4f   : > { %557 = vmatprep.mubr.bf16.mxu0 %v1799_v2 }
  0x56   : > { %558 = vmatmul.mubr.bf16.gmra.mrb[24].mxu0 %v1637_v34 }
  0x57   : > { %567 = vmatprep.mubr.bf16.mxu0 %v1799_v2 }
  0x5e   : > { %568 = vmatmul.mubr.bf16.gmra.mrb[28].mxu0 %v1638_v35 }
  0x5f   : > { %577 = vmatprep.mubr.bf16.mxu0 %v1799_v2 }
  0x66   : > { %578 = vmatmul.mubr.bf16.gmra.mrb[32].mxu0 %v1639_v36 }
  0x67   : > { %587 = vmatprep.mubr.bf16.mxu0 %v1799_v2 }
  0x6e   : > { %588 = vmatmul.mubr.bf16.gmra.mrb[36].mxu0 %v1640_v37 }
  0x6f   : > { %597 = vmatprep.mubr.bf16.mxu0 %v1799_v2 }
  0x76   : > { %598 = vmatmul.mubr.bf16.gmra.mrb[40].mxu0 %v1641_v38 }
  0x77   : > { %607 = vmatprep.mubr.bf16.mxu0 %v1799_v2 }
  0x7e   : > { %608 = vmatmul.mubr.bf16.gmra.mrb[44].mxu0 %v1642_v40 }
  0x7f   : > { %617 = vmatprep.mubr.bf16.mxu0 %v1799_v2 }
  0x86   : > { %618 = vmatmul.mubr.bf16.gmra.mrb[48].mxu0 %v1643_v45 }
  0x87   : > { %627 = vmatprep.mubr.bf16.mxu0 %v1799_v2 }
  0x8e   : > { %628 = vmatmul.mubr.bf16.gmra.mrb[52].mxu0 %v1644_v46 }
  0x8f   : > { %637 = vmatprep.mubr.bf16.mxu0 %v1799_v2 }
  0x96   : > { %638 = vmatmul.mubr.bf16.gmra.mrb[56].mxu0 %v1645_v47 }
  0x97   : > { %647 = vmatprep.mubr.bf16.mxu0 %v1799_v2 }
  0x9e   : > { %648 = vmatmul.mubr.bf16.gmra.mrb[60].mxu0 %v1646_v48 }
  0xf9   : > { %v499_v56 = vpop.f32.mrb[0].mxu0 }
  0xfa   : > { %v500_v57 = vadd.f32 %v499_v56, %v1977_v54  ;;  %v501_v58 = vpop.f32.mrb[1].mxu0 }
  0xfb   : > { %v502_v59 = vadd.f32 %v501_v58, %v1979_v55  ;;  %v503_v60 = vpop.f32.mrb[2].mxu0 }
  0xfc   : > { %v504_v61 = vadd.f32 %v503_v60, %v1977_v54  ;;  %v505_v62 = vpop.f32.mrb[3].mxu0  ;;  %v658_v0 = vmax.f32 %v500_v57, 0.0 }
  0xfd   : > { %v506_v63 = vadd.f32 %v505_v62, %v1979_v55  ;;  %v659_v2 = vmax.f32 %v502_v59, 0.0 }
  0xfe   : > { %v660_v1 = vmax.f32 %v504_v61, 0.0 }
  0xff   : > { %v661_v3 = vmax.f32 %v506_v63, 0.0 }
 0x100   : > { %v722_v4 = vpack.c.bf16 %v660_v1, %v658_v0 }
 0x101   : > { %v509_v5 = vpop.f32.mrb[4].mxu0  ;;  %v723_v6 = vpack.c.bf16 %v661_v3, %v659_v2 }
 0x102   : > { %v510_v7 = vadd.f32 %v509_v5, %v1977_v54  ;;  %v511_v8 = vpop.f32.mrb[5].mxu0 }
 0x103   : > { %v512_v9 = vadd.f32 %v511_v8, %v1979_v55  ;;  %v513_v10 = vpop.f32.mrb[6].mxu0  ;;  %921 = vmatprep.mubr.bf16.mxu1 %v723_v6 }
 0x104   : > { %v514_v11 = vadd.f32 %v513_v10, %v1977_v54  ;;  %v515_v12 = vpop.f32.mrb[7].mxu0  ;;  %922 = vmatmul.mubr.bf16.vlgmr.msra.gmra.mrb[0].mxu1 %v722_v4  ;;  %v662_v14 = vmax.f32 %v510_v7, 0.0 }
 0x105   : > { %v516_v13 = vadd.f32 %v515_v12, %v1979_v55  ;;  %v663_v16 = vmax.f32 %v512_v9, 0.0 }
 0x106   : > { %v664_v15 = vmax.f32 %v514_v11, 0.0 }
 0x107   : > { %v665_v17 = vmax.f32 %v516_v13, 0.0 }
 0x108   : > { %v724_v18 = vpack.c.bf16 %v664_v15, %v662_v14 }
 0x109   : > { %v725_v19 = vpack.c.bf16 %v665_v17, %v663_v16  ;;  %v519_v20 = vpop.f32.mrb[8].mxu0 }
 0x10a   : > { %v520_v21 = vadd.f32 %v519_v20, %v1977_v54  ;;  %v521_v22 = vpop.f32.mrb[9].mxu0 }
 0x10b   : > { %v522_v23 = vadd.f32 %v521_v22, %v1979_v55  ;;  %v523_v24 = vpop.f32.mrb[10].mxu0  ;;  %929 = vmatprep.mubr.bf16.mxu1 %v725_v19 }
 0x10c   : > { %v524_v25 = vadd.f32 %v523_v24, %v1977_v54  ;;  %v525_v26 = vpop.f32.mrb[11].mxu0  ;;  %930 = vmatmul.mubr.bf16.gmra.mrb[4].mxu1 %v724_v18  ;;  %v666_v28 = vmax.f32 %v520_v21, 0.0 }
 0x10d   : > { %v526_v27 = vadd.f32 %v525_v26, %v1979_v55  ;;  %v667_v30 = vmax.f32 %v522_v23, 0.0 }
 0x10e   : > { %v668_v29 = vmax.f32 %v524_v25, 0.0 }
 0x10f   : > { %v669_v31 = vmax.f32 %v526_v27, 0.0 }
 0x110   : > { %v726_v32 = vpack.c.bf16 %v668_v29, %v666_v28 }
 0x111   : > { %v727_v33 = vpack.c.bf16 %v669_v31, %v667_v30  ;;  %v529_v34 = vpop.f32.mrb[12].mxu0 }
 0x112   : > { %v530_v35 = vadd.f32 %v529_v34, %v1977_v54  ;;  %v531_v36 = vpop.f32.mrb[13].mxu0 }
 0x113   : > { %v532_v37 = vadd.f32 %v531_v36, %v1979_v55  ;;  %v533_v38 = vpop.f32.mrb[14].mxu0  ;;  %937 = vmatprep.mubr.bf16.mxu1 %v727_v33 }
 0x114   : > { %v534_v39 = vadd.f32 %v533_v38, %v1977_v54  ;;  %v535_v40 = vpop.f32.mrb[15].mxu0  ;;  %938 = vmatmul.mubr.bf16.gmra.mrb[8].mxu1 %v726_v32  ;;  %v670_v42 = vmax.f32 %v530_v35, 0.0 }
 0x115   : > { %v536_v41 = vadd.f32 %v535_v40, %v1979_v55  ;;  %v671_v44 = vmax.f32 %v532_v37, 0.0 }
 0x116   : > { %v672_v43 = vmax.f32 %v534_v39, 0.0 }
 0x117   : > { %v673_v45 = vmax.f32 %v536_v41, 0.0 }
 0x118   : > { %v728_v46 = vpack.c.bf16 %v672_v43, %v670_v42 }
 0x119   : > { %v729_v47 = vpack.c.bf16 %v673_v45, %v671_v44  ;;  %v539_v48 = vpop.f32.mrb[16].mxu0 }
 0x11a   : > { %v540_v49 = vadd.f32 %v539_v48, %v1977_v54  ;;  %v541_v50 = vpop.f32.mrb[17].mxu0 }
 0x11b   : > { %v542_v51 = vadd.f32 %v541_v50, %v1979_v55  ;;  %v543_v52 = vpop.f32.mrb[18].mxu0  ;;  %945 = vmatprep.mubr.bf16.mxu1 %v729_v47 }
 0x11c   : > { %v544_v53 = vadd.f32 %v543_v52, %v1977_v54  ;;  %v545_v56 = vpop.f32.mrb[19].mxu0  ;;  %946 = vmatmul.mubr.bf16.gmra.mrb[12].mxu1 %v728_v46  ;;  %v674_v58 = vmax.f32 %v540_v49, 0.0 }
 0x11d   : > { %v546_v57 = vadd.f32 %v545_v56, %v1979_v55  ;;  %v675_v60 = vmax.f32 %v542_v51, 0.0 }
 0x11e   : > { %v676_v59 = vmax.f32 %v544_v53, 0.0 }
 0x11f   : > { %v677_v61 = vmax.f32 %v546_v57, 0.0 }
 0x120   : > { %v730_v62 = vpack.c.bf16 %v676_v59, %v674_v58 }
 0x121   : > { %v731_v63 = vpack.c.bf16 %v677_v61, %v675_v60  ;;  %v549_v0 = vpop.f32.mrb[20].mxu0 }
 0x122   : > { %v550_v1 = vadd.f32 %v549_v0, %v1977_v54  ;;  %v551_v2 = vpop.f32.mrb[21].mxu0 }
 0x123   : > { %v552_v3 = vadd.f32 %v551_v2, %v1979_v55  ;;  %v553_v4 = vpop.f32.mrb[22].mxu0  ;;  %953 = vmatprep.mubr.bf16.mxu1 %v731_v63 }
 0x124   : > { %v554_v5 = vadd.f32 %v553_v4, %v1977_v54  ;;  %v555_v6 = vpop.f32.mrb[23].mxu0  ;;  %954 = vmatmul.mubr.bf16.gmra.mrb[16].mxu1 %v730_v62  ;;  %v678_v8 = vmax.f32 %v550_v1, 0.0 }
 0x125   : > { %v556_v7 = vadd.f32 %v555_v6, %v1979_v55  ;;  %v679_v10 = vmax.f32 %v552_v3, 0.0 }
 0x126   : > { %v680_v9 = vmax.f32 %v554_v5, 0.0 }
 0x127   : > { %v681_v11 = vmax.f32 %v556_v7, 0.0 }
 0x128   : > { %v732_v12 = vpack.c.bf16 %v680_v9, %v678_v8 }
 0x129   : > { %v733_v13 = vpack.c.bf16 %v681_v11, %v679_v10  ;;  %v559_v14 = vpop.f32.mrb[24].mxu0 }
 0x12a   : > { %v560_v15 = vadd.f32 %v559_v14, %v1977_v54  ;;  %v561_v16 = vpop.f32.mrb[25].mxu0 }
 0x12b   : > { %v562_v17 = vadd.f32 %v561_v16, %v1979_v55  ;;  %v563_v18 = vpop.f32.mrb[26].mxu0  ;;  %961 = vmatprep.mubr.bf16.mxu1 %v733_v13 }
 0x12c   : > { %v564_v19 = vadd.f32 %v563_v18, %v1977_v54  ;;  %v565_v20 = vpop.f32.mrb[27].mxu0  ;;  %962 = vmatmul.mubr.bf16.gmra.mrb[20].mxu1 %v732_v12  ;;  %v682_v22 = vmax.f32 %v560_v15, 0.0 }
 0x12d   : > { %v566_v21 = vadd.f32 %v565_v20, %v1979_v55  ;;  %v683_v24 = vmax.f32 %v562_v17, 0.0 }
 0x12e   : > { %v684_v23 = vmax.f32 %v564_v19, 0.0 }
 0x12f   : > { %v685_v25 = vmax.f32 %v566_v21, 0.0 }
 0x130   : > { %v734_v26 = vpack.c.bf16 %v684_v23, %v682_v22 }
 0x131   : > { %v735_v27 = vpack.c.bf16 %v685_v25, %v683_v24  ;;  %v569_v28 = vpop.f32.mrb[28].mxu0 }
 0x132   : > { %v570_v29 = vadd.f32 %v569_v28, %v1977_v54  ;;  %v571_v30 = vpop.f32.mrb[29].mxu0 }
 0x133   : > { %v572_v31 = vadd.f32 %v571_v30, %v1979_v55  ;;  %v573_v32 = vpop.f32.mrb[30].mxu0  ;;  %969 = vmatprep.mubr.bf16.mxu1 %v735_v27 }
 0x134   : > { %v574_v33 = vadd.f32 %v573_v32, %v1977_v54  ;;  %v575_v34 = vpop.f32.mrb[31].mxu0  ;;  %970 = vmatmul.mubr.bf16.gmra.mrb[24].mxu1 %v734_v26  ;;  %v686_v36 = vmax.f32 %v570_v29, 0.0 }
 0x135   : > { %v576_v35 = vadd.f32 %v575_v34, %v1979_v55  ;;  %v687_v38 = vmax.f32 %v572_v31, 0.0 }
 0x136   : > { %v688_v37 = vmax.f32 %v574_v33, 0.0 }
 0x137   : > { %v689_v39 = vmax.f32 %v576_v35, 0.0 }
 0x138   : > { %v736_v40 = vpack.c.bf16 %v688_v37, %v686_v36 }
 0x139   : > { %v737_v41 = vpack.c.bf16 %v689_v39, %v687_v38  ;;  %v579_v42 = vpop.f32.mrb[32].mxu0 }
 0x13a   : > { %v580_v43 = vadd.f32 %v579_v42, %v1977_v54  ;;  %v581_v44 = vpop.f32.mrb[33].mxu0 }
 0x13b   : > { %v582_v45 = vadd.f32 %v581_v44, %v1979_v55  ;;  %v583_v46 = vpop.f32.mrb[34].mxu0  ;;  %977 = vmatprep.mubr.bf16.mxu1 %v737_v41 }
 0x13c   : > { %v584_v47 = vadd.f32 %v583_v46, %v1977_v54  ;;  %v585_v48 = vpop.f32.mrb[35].mxu0  ;;  %978 = vmatmul.mubr.bf16.gmra.mrb[28].mxu1 %v736_v40  ;;  %v690_v50 = vmax.f32 %v580_v43, 0.0 }
 0x13d   : > { %v586_v49 = vadd.f32 %v585_v48, %v1979_v55  ;;  %v691_v52 = vmax.f32 %v582_v45, 0.0 }
 0x13e   : > { %v692_v51 = vmax.f32 %v584_v47, 0.0 }
 0x13f   : > { %v693_v53 = vmax.f32 %v586_v49, 0.0 }
 0x140   : > { %v738_v56 = vpack.c.bf16 %v692_v51, %v690_v50 }
 0x141   : > { %v739_v57 = vpack.c.bf16 %v693_v53, %v691_v52  ;;  %v589_v58 = vpop.f32.mrb[36].mxu0 }
 0x142   : > { %v590_v59 = vadd.f32 %v589_v58, %v1977_v54  ;;  %v591_v60 = vpop.f32.mrb[37].mxu0 }
 0x143   : > { %v592_v61 = vadd.f32 %v591_v60, %v1979_v55  ;;  %v593_v62 = vpop.f32.mrb[38].mxu0  ;;  %985 = vmatprep.mubr.bf16.mxu1 %v739_v57 }
 0x144   : > { %v594_v63 = vadd.f32 %v593_v62, %v1977_v54  ;;  %v595_v0 = vpop.f32.mrb[39].mxu0  ;;  %986 = vmatmul.mubr.bf16.gmra.mrb[32].mxu1 %v738_v56  ;;  %v694_v2 = vmax.f32 %v590_v59, 0.0 }
 0x145   : > { %v596_v1 = vadd.f32 %v595_v0, %v1979_v55  ;;  %v695_v4 = vmax.f32 %v592_v61, 0.0 }
 0x146   : > { %v696_v3 = vmax.f32 %v594_v63, 0.0 }
 0x147   : > { %v697_v5 = vmax.f32 %v596_v1, 0.0 }
 0x148   : > { %v740_v6 = vpack.c.bf16 %v696_v3, %v694_v2 }
 0x149   : > { %v741_v7 = vpack.c.bf16 %v697_v5, %v695_v4  ;;  %v599_v8 = vpop.f32.mrb[40].mxu0 }
 0x14a   : > { %v600_v9 = vadd.f32 %v599_v8, %v1977_v54  ;;  %v601_v10 = vpop.f32.mrb[41].mxu0 }
 0x14b   : > { %v602_v11 = vadd.f32 %v601_v10, %v1979_v55  ;;  %v603_v12 = vpop.f32.mrb[42].mxu0  ;;  %993 = vmatprep.mubr.bf16.mxu1 %v741_v7 }
 0x14c   : > { %v604_v13 = vadd.f32 %v603_v12, %v1977_v54  ;;  %v605_v14 = vpop.f32.mrb[43].mxu0  ;;  %994 = vmatmul.mubr.bf16.gmra.mrb[36].mxu1 %v740_v6  ;;  %v698_v16 = vmax.f32 %v600_v9, 0.0 }
 0x14d   : > { %v606_v15 = vadd.f32 %v605_v14, %v1979_v55  ;;  %v699_v18 = vmax.f32 %v602_v11, 0.0 }
 0x14e   : > { %v700_v17 = vmax.f32 %v604_v13, 0.0 }
 0x14f   : > { %v701_v19 = vmax.f32 %v606_v15, 0.0 }
 0x150   : > { %v742_v20 = vpack.c.bf16 %v700_v17, %v698_v16 }
 0x151   : > { %v743_v21 = vpack.c.bf16 %v701_v19, %v699_v18  ;;  %v609_v22 = vpop.f32.mrb[44].mxu0 }
 0x152   : > { %v610_v23 = vadd.f32 %v609_v22, %v1977_v54  ;;  %v611_v24 = vpop.f32.mrb[45].mxu0 }
 0x153   : > { %v612_v25 = vadd.f32 %v611_v24, %v1979_v55  ;;  %v613_v26 = vpop.f32.mrb[46].mxu0  ;;  %1001 = vmatprep.mubr.bf16.mxu1 %v743_v21 }
 0x154   : > { %v614_v27 = vadd.f32 %v613_v26, %v1977_v54  ;;  %v615_v28 = vpop.f32.mrb[47].mxu0  ;;  %1002 = vmatmul.mubr.bf16.gmra.mrb[40].mxu1 %v742_v20  ;;  %v702_v30 = vmax.f32 %v610_v23, 0.0 }
 0x155   : > { %v616_v29 = vadd.f32 %v615_v28, %v1979_v55  ;;  %v703_v32 = vmax.f32 %v612_v25, 0.0 }
 0x156   : > { %v704_v31 = vmax.f32 %v614_v27, 0.0 }
 0x157   : > { %v705_v33 = vmax.f32 %v616_v29, 0.0 }
 0x158   : > { %v744_v34 = vpack.c.bf16 %v704_v31, %v702_v30 }
 0x159   : > { %v745_v35 = vpack.c.bf16 %v705_v33, %v703_v32  ;;  %v619_v36 = vpop.f32.mrb[48].mxu0  ;;  %v2048_v32 = vld [vmem:[%s2383_s4] ss:$0 sm:$0xff] }
 0x15a   : > { %v620_v37 = vadd.f32 %v619_v36, %v1977_v54  ;;  %v621_v38 = vpop.f32.mrb[49].mxu0 }
 0x15b   : > { %v622_v39 = vadd.f32 %v621_v38, %v1979_v55  ;;  %v623_v40 = vpop.f32.mrb[50].mxu0  ;;  %1009 = vmatprep.mubr.bf16.mxu1 %v745_v35 }
 0x15c   : > { %v624_v41 = vadd.f32 %v623_v40, %v1977_v54  ;;  %v625_v42 = vpop.f32.mrb[51].mxu0  ;;  %1010 = vmatmul.mubr.bf16.gmra.mrb[44].mxu1 %v744_v34  ;;  %v706_v44 = vmax.f32 %v620_v37, 0.0 }
 0x15d   : > { %v626_v43 = vadd.f32 %v625_v42, %v1979_v55  ;;  %v707_v46 = vmax.f32 %v622_v39, 0.0 }
 0x15e   : > { %v708_v45 = vmax.f32 %v624_v41, 0.0 }
 0x15f   : > { %v709_v47 = vmax.f32 %v626_v43, 0.0 }
 0x160   : > { %v746_v48 = vpack.c.bf16 %v708_v45, %v706_v44 }
 0x161   : > { %v747_v49 = vpack.c.bf16 %v709_v47, %v707_v46  ;;  %v629_v50 = vpop.f32.mrb[52].mxu0 }
 0x162   : > { %v630_v51 = vadd.f32 %v629_v50, %v1977_v54  ;;  %v631_v52 = vpop.f32.mrb[53].mxu0 }
 0x163   : > { %v632_v53 = vadd.f32 %v631_v52, %v1979_v55  ;;  %v633_v56 = vpop.f32.mrb[54].mxu0  ;;  %1017 = vmatprep.mubr.bf16.mxu1 %v747_v49 }
 0x164   : > { %v634_v57 = vadd.f32 %v633_v56, %v1977_v54  ;;  %v635_v58 = vpop.f32.mrb[55].mxu0  ;;  %1018 = vmatmul.mubr.bf16.gmra.mrb[48].mxu1 %v746_v48  ;;  %v710_v60 = vmax.f32 %v630_v51, 0.0 }
 0x165   : > { %v636_v59 = vadd.f32 %v635_v58, %v1979_v55  ;;  %v711_v62 = vmax.f32 %v632_v53, 0.0 }
 0x166   : > { %v712_v61 = vmax.f32 %v634_v57, 0.0 }
 0x167   : > { %v713_v63 = vmax.f32 %v636_v59, 0.0 }
 0x168   : > { %v748_v0 = vpack.c.bf16 %v712_v61, %v710_v60 }
 0x169   : > { %v749_v1 = vpack.c.bf16 %v713_v63, %v711_v62  ;;  %v639_v2 = vpop.f32.mrb[56].mxu0 }
 0x16a   : > { %v640_v3 = vadd.f32 %v639_v2, %v1977_v54  ;;  %v641_v4 = vpop.f32.mrb[57].mxu0 }
 0x16b   : > { %v642_v5 = vadd.f32 %v641_v4, %v1979_v55  ;;  %v643_v6 = vpop.f32.mrb[58].mxu0  ;;  %1025 = vmatprep.mubr.bf16.mxu1 %v749_v1 }
 0x16c   : > { %v644_v7 = vadd.f32 %v643_v6, %v1977_v54  ;;  %v645_v8 = vpop.f32.mrb[59].mxu0  ;;  %1026 = vmatmul.mubr.bf16.gmra.mrb[52].mxu1 %v748_v0  ;;  %v714_v10 = vmax.f32 %v640_v3, 0.0 }
 0x16d   : > { %v646_v9 = vadd.f32 %v645_v8, %v1979_v55  ;;  %v715_v12 = vmax.f32 %v642_v5, 0.0 }
 0x16e   : > { %v716_v11 = vmax.f32 %v644_v7, 0.0 }
 0x16f   : > { %v717_v13 = vmax.f32 %v646_v9, 0.0 }
 0x170   : > { %v750_v14 = vpack.c.bf16 %v716_v11, %v714_v10 }
 0x171   : > { %v751_v15 = vpack.c.bf16 %v717_v13, %v715_v12  ;;  %v649_v16 = vpop.f32.mrb[60].mxu0 }
 0x172   : > { %v650_v17 = vadd.f32 %v649_v16, %v1977_v54  ;;  %v651_v18 = vpop.f32.mrb[61].mxu0 }
 0x173   : > { %v652_v19 = vadd.f32 %v651_v18, %v1979_v55  ;;  %v653_v20 = vpop.f32.mrb[62].mxu0  ;;  %1033 = vmatprep.mubr.bf16.mxu1 %v751_v15 }
 0x174   : > { %v654_v21 = vadd.f32 %v653_v20, %v1977_v54  ;;  %v655_v22 = vpop.f32.mrb[63].mxu0  ;;  %1034 = vmatmul.mubr.bf16.gmra.mrb[56].mxu1 %v750_v14  ;;  %v718_v24 = vmax.f32 %v650_v17, 0.0 }
 0x175   : > { %v656_v23 = vadd.f32 %v655_v22, %v1979_v55  ;;  %v719_v26 = vmax.f32 %v652_v19, 0.0 }
 0x176   : > { %v720_v25 = vmax.f32 %v654_v21, 0.0 }
 0x177   : > { %v721_v27 = vmax.f32 %v656_v23, 0.0 }
 0x178   : > { %v752_v28 = vpack.c.bf16 %v720_v25, %v718_v24 }
 0x179   : > { %v753_v29 = vpack.c.bf16 %v721_v27, %v719_v26 }
 0x17b   : > { %1041 = vmatprep.mubr.bf16.mxu1 %v753_v29 }
 0x17c   : > { %1042 = vmatmul.mubr.bf16.gmra.mrb[60].mxu1 %v752_v28 }
 0x1d7   : > { %v1502_v30 = vpop.f32.mrb[0].mxu1 }
 0x1d8   : > { %v1503_v31 = vpop.f32.mrb[1].mxu1 }
 0x1d9   : > { %v1504_v54 = vadd.f32 %v1503_v31, %v1502_v30  ;;  %v1505_v33 = vpop.f32.mrb[2].mxu1 }
 0x1da   : > { %v1506_v34 = vpop.f32.mrb[3].mxu1 }
 0x1db   : > { %v1507_v35 = vadd.f32 %v1506_v34, %v1505_v33  ;;  %v2051_v55 = vadd.f32 %v1504_v54, %v2048_v32 }
 0x1dd   : > { %1050 = vmax.xlane.f32.xlu0 %v2051_v55  ;;  %v2055_v37 = vadd.f32 %v1507_v35, %v2048_v32 }
 0x1df   : > { %v1508_v36 = vpop.f32.mrb[4].mxu1 }
 0x1e0   : > { %v1509_v38 = vpop.f32.mrb[5].mxu1 }
 0x1e1   : > { %v1510_v39 = vadd.f32 %v1509_v38, %v1508_v36  ;;  %v1511_v40 = vpop.f32.mrb[6].mxu1  ;;  %1052 = vmax.xlane.f32.xlu0 %v2055_v37 }
 0x1e2   : > { %v1512_v41 = vpop.f32.mrb[7].mxu1 }
 0x1e3   : > { %v1513_v42 = vadd.f32 %v1512_v41, %v1511_v40  ;;  %v2059_v43 = vadd.f32 %v1510_v39, %v2048_v32 }
 0x1e5   : > { %1054 = vmax.xlane.f32.xlu1 %v2059_v43  ;;  %v2063_v45 = vadd.f32 %v1513_v42, %v2048_v32 }
 0x1e7   : > { %v1514_v44 = vpop.f32.mrb[8].mxu1 }
 0x1e8   : > { %v1515_v46 = vpop.f32.mrb[9].mxu1 }
 0x1e9   : > { %v1516_v47 = vadd.f32 %v1515_v46, %v1514_v44  ;;  %v1517_v48 = vpop.f32.mrb[10].mxu1  ;;  %1056 = vmax.xlane.f32.xlu1 %v2063_v45 }
 0x1ea   : > { %v1518_v49 = vpop.f32.mrb[11].mxu1 }
 0x1eb   : > { %v1519_v50 = vadd.f32 %v1518_v49, %v1517_v48  ;;  %v2067_v51 = vadd.f32 %v1516_v47, %v2048_v32 }
 0x1ed   : > { %1058 = vmax.xlane.f32.xlu0 %v2067_v51  ;;  %v2071_v52 = vadd.f32 %v1519_v50, %v2048_v32 }
 0x1ef   : > { %v1520_v53 = vpop.f32.mrb[12].mxu1  ;;  %1060 = vmax.xlane.f32.xlu1 %v2071_v52 }
 0x1f0   : > { %v1521_v56 = vpop.f32.mrb[13].mxu1 }
 0x1f1   : > { %v1522_v57 = vadd.f32 %v1521_v56, %v1520_v53  ;;  %v1523_v58 = vpop.f32.mrb[14].mxu1 }
 0x1f2   : > { %v1524_v59 = vpop.f32.mrb[15].mxu1 }
 0x1f3   : > { %v1525_v60 = vadd.f32 %v1524_v59, %v1523_v58  ;;  %v2075_v61 = vadd.f32 %v1522_v57, %v2048_v32 }
 0x1f5   : > { %1062 = vmax.xlane.f32.xlu0 %v2075_v61  ;;  %v2079_v62 = vadd.f32 %v1525_v60, %v2048_v32 }
 0x1f7   : > { %v1526_v63 = vpop.f32.mrb[16].mxu1  ;;  %1064 = vmax.xlane.f32.xlu1 %v2079_v62 }
 0x1f8   : > { %v1527_v0 = vpop.f32.mrb[17].mxu1 }
 0x1f9   : > { %v1528_v1 = vadd.f32 %v1527_v0, %v1526_v63  ;;  %v1529_v2 = vpop.f32.mrb[18].mxu1 }
 0x1fa   : > { %v1530_v3 = vpop.f32.mrb[19].mxu1 }
 0x1fb   : > { %v1531_v4 = vadd.f32 %v1530_v3, %v1529_v2  ;;  %v2083_v5 = vadd.f32 %v1528_v1, %v2048_v32 }
 0x1fd   : > { %1066 = vmax.xlane.f32.xlu0 %v2083_v5  ;;  %v2087_v6 = vadd.f32 %v1531_v4, %v2048_v32 }
 0x1ff   : > { %v1532_v7 = vpop.f32.mrb[20].mxu1  ;;  %1068 = vmax.xlane.f32.xlu1 %v2087_v6 }
 0x200   : > { %v1533_v8 = vpop.f32.mrb[21].mxu1 }
 0x201   : > { %v1534_v9 = vadd.f32 %v1533_v8, %v1532_v7  ;;  %v1535_v10 = vpop.f32.mrb[22].mxu1 }
 0x202   : > { %v1536_v11 = vpop.f32.mrb[23].mxu1 }
 0x203   : > { %v1537_v12 = vadd.f32 %v1536_v11, %v1535_v10  ;;  %v2091_v13 = vadd.f32 %v1534_v9, %v2048_v32 }
 0x205   : > { %1070 = vmax.xlane.f32.xlu0 %v2091_v13  ;;  %v2095_v14 = vadd.f32 %v1537_v12, %v2048_v32 }
 0x207   : > { %v1538_v15 = vpop.f32.mrb[24].mxu1  ;;  %1072 = vmax.xlane.f32.xlu1 %v2095_v14 }
 0x208   : > { %v1539_v16 = vpop.f32.mrb[25].mxu1 }
 0x209   : > { %v1540_v17 = vadd.f32 %v1539_v16, %v1538_v15  ;;  %v1541_v18 = vpop.f32.mrb[26].mxu1 }
 0x20a   : > { %v1542_v19 = vpop.f32.mrb[27].mxu1 }
 0x20b   : > { %v1543_v20 = vadd.f32 %v1542_v19, %v1541_v18  ;;  %v2099_v21 = vadd.f32 %v1540_v17, %v2048_v32 }
 0x20d   : > { %1074 = vmax.xlane.f32.xlu0 %v2099_v21  ;;  %v2103_v22 = vadd.f32 %v1543_v20, %v2048_v32 }
 0x20f   : > { %v1544_v23 = vpop.f32.mrb[28].mxu1  ;;  %1076 = vmax.xlane.f32.xlu1 %v2103_v22 }
 0x210   : > { %v1545_v24 = vpop.f32.mrb[29].mxu1 }
 0x211   : > { %v1546_v25 = vadd.f32 %v1545_v24, %v1544_v23  ;;  %v1547_v26 = vpop.f32.mrb[30].mxu1 }
 0x212   : > { %v1548_v27 = vpop.f32.mrb[31].mxu1 }
 0x213   : > { %v1549_v28 = vadd.f32 %v1548_v27, %v1547_v26  ;;  %v2107_v29 = vadd.f32 %v1546_v25, %v2048_v32 }
 0x215   : > { %1078 = vmax.xlane.f32.xlu0 %v2107_v29  ;;  %v2111_v30 = vadd.f32 %v1549_v28, %v2048_v32 }
 0x217   : > { %v1550_v31 = vpop.f32.mrb[32].mxu1  ;;  %1080 = vmax.xlane.f32.xlu1 %v2111_v30 }
 0x218   : > { %v1551_v54 = vpop.f32.mrb[33].mxu1 }
 0x219   : > { %v1552_v33 = vadd.f32 %v1551_v54, %v1550_v31  ;;  %v1553_v34 = vpop.f32.mrb[34].mxu1 }
 0x21a   : > { %v1554_v35 = vpop.f32.mrb[35].mxu1 }
 0x21b   : > { %v1555_v36 = vadd.f32 %v1554_v35, %v1553_v34  ;;  %v2115_v38 = vadd.f32 %v1552_v33, %v2048_v32 }
 0x21d   : > { %1082 = vmax.xlane.f32.xlu0 %v2115_v38  ;;  %v2119_v39 = vadd.f32 %v1555_v36, %v2048_v32 }
 0x21f   : > { %v1556_v40 = vpop.f32.mrb[36].mxu1  ;;  %1084 = vmax.xlane.f32.xlu1 %v2119_v39 }
 0x220   : > { %v1557_v41 = vpop.f32.mrb[37].mxu1 }
 0x221   : > { %v1558_v42 = vadd.f32 %v1557_v41, %v1556_v40  ;;  %v1559_v44 = vpop.f32.mrb[38].mxu1 }
 0x222   : > { %v1560_v46 = vpop.f32.mrb[39].mxu1 }
 0x223   : > { %v1561_v47 = vadd.f32 %v1560_v46, %v1559_v44  ;;  %v2123_v48 = vadd.f32 %v1558_v42, %v2048_v32 }
 0x225   : > { %1086 = vmax.xlane.f32.xlu0 %v2123_v48  ;;  %v2127_v49 = vadd.f32 %v1561_v47, %v2048_v32 }
 0x227   : > { %v1562_v50 = vpop.f32.mrb[40].mxu1  ;;  %1088 = vmax.xlane.f32.xlu1 %v2127_v49 }
 0x228   : > { %v1563_v53 = vpop.f32.mrb[41].mxu1 }
 0x229   : > { %v1564_v56 = vadd.f32 %v1563_v53, %v1562_v50  ;;  %v1565_v57 = vpop.f32.mrb[42].mxu1 }
 0x22a   : > { %v1566_v58 = vpop.f32.mrb[43].mxu1 }
 0x22b   : > { %v1567_v59 = vadd.f32 %v1566_v58, %v1565_v57  ;;  %v2131_v60 = vadd.f32 %v1564_v56, %v2048_v32 }
 0x22d   : > { %1090 = vmax.xlane.f32.xlu0 %v2131_v60  ;;  %v2135_v63 = vadd.f32 %v1567_v59, %v2048_v32 }
 0x22f   : > { %v1568_v0 = vpop.f32.mrb[44].mxu1  ;;  %1092 = vmax.xlane.f32.xlu1 %v2135_v63 }
 0x230   : > { %v1569_v1 = vpop.f32.mrb[45].mxu1 }
 0x231   : > { %v1570_v2 = vadd.f32 %v1569_v1, %v1568_v0  ;;  %v1571_v3 = vpop.f32.mrb[46].mxu1 }
 0x232   : > { %v1572_v4 = vpop.f32.mrb[47].mxu1 }
 0x233   : > { %v1573_v7 = vadd.f32 %v1572_v4, %v1571_v3  ;;  %v2139_v8 = vadd.f32 %v1570_v2, %v2048_v32 }
 0x235   : > { %1094 = vmax.xlane.f32.xlu0 %v2139_v8  ;;  %v2143_v9 = vadd.f32 %v1573_v7, %v2048_v32 }
 0x237   : > { %v1574_v10 = vpop.f32.mrb[48].mxu1  ;;  %1096 = vmax.xlane.f32.xlu1 %v2143_v9 }
 0x238   : > { %v1575_v11 = vpop.f32.mrb[49].mxu1 }
 0x239   : > { %v1576_v12 = vadd.f32 %v1575_v11, %v1574_v10  ;;  %v1577_v15 = vpop.f32.mrb[50].mxu1 }
 0x23a   : > { %v1578_v16 = vpop.f32.mrb[51].mxu1 }
 0x23b   : > { %v1579_v17 = vadd.f32 %v1578_v16, %v1577_v15  ;;  %v2147_v18 = vadd.f32 %v1576_v12, %v2048_v32 }
 0x23d   : > { %1098 = vmax.xlane.f32.xlu0 %v2147_v18  ;;  %v2151_v19 = vadd.f32 %v1579_v17, %v2048_v32 }
 0x23f   : > { %v1580_v20 = vpop.f32.mrb[52].mxu1  ;;  %1100 = vmax.xlane.f32.xlu1 %v2151_v19 }
 0x240   : > { %v1581_v23 = vpop.f32.mrb[53].mxu1 }
 0x241   : > { %v1582_v24 = vadd.f32 %v1581_v23, %v1580_v20  ;;  %v1583_v25 = vpop.f32.mrb[54].mxu1 }
 0x242   : > { %v1584_v26 = vpop.f32.mrb[55].mxu1 }
 0x243   : > { %v1585_v27 = vadd.f32 %v1584_v26, %v1583_v25  ;;  %v2155_v28 = vadd.f32 %v1582_v24, %v2048_v32 }
 0x245   : > { %1102 = vmax.xlane.f32.xlu0 %v2155_v28  ;;  %v2159_v31 = vadd.f32 %v1585_v27, %v2048_v32 }
 0x247   : > { %v1586_v54 = vpop.f32.mrb[56].mxu1  ;;  %1104 = vmax.xlane.f32.xlu1 %v2159_v31 }
 0x248   : > { %v1587_v33 = vpop.f32.mrb[57].mxu1 }
 0x249   : > { %v1588_v34 = vadd.f32 %v1587_v33, %v1586_v54  ;;  %v1589_v35 = vpop.f32.mrb[58].mxu1 }
 0x24a   : > { %v1590_v36 = vpop.f32.mrb[59].mxu1 }
 0x24b   : > { %v1591_v40 = vadd.f32 %v1590_v36, %v1589_v35  ;;  %v2163_v41 = vadd.f32 %v1588_v34, %v2048_v32 }
 0x24d   : > { %1106 = vmax.xlane.f32.xlu0 %v2163_v41  ;;  %v2167_v42 = vadd.f32 %v1591_v40, %v2048_v32 }
 0x24f   : > { %v1592_v44 = vpop.f32.mrb[60].mxu1  ;;  %1108 = vmax.xlane.f32.xlu1 %v2167_v42 }
 0x250   : > { %v1593_v46 = vpop.f32.mrb[61].mxu1 }
 0x251   : > { %v1594_v47 = vadd.f32 %v1593_v46, %v1592_v44  ;;  %v1595_v50 = vpop.f32.mrb[62].mxu1 }
 0x252   : > { %v1596_v53 = vpop.f32.mrb[63].mxu1 }
 0x253   : > { %v1597_v56 = vadd.f32 %v1596_v53, %v1595_v50  ;;  %v2171_v57 = vadd.f32 %v1594_v47, %v2048_v32 }
 0x255   : > { %1110 = vmax.xlane.f32.xlu0 %v2171_v57  ;;  %v2175_v58 = vadd.f32 %v1597_v56, %v2048_v32 }
 0x257   : > { %1112 = vmax.xlane.f32.xlu1 %v2175_v58 }
 0x26a   : > { %v1051_v59 = vpop.xlane.xlu0 %1050 }
 0x26b   : > { %v1114_v0 = vsub.f32 %v2051_v55, %v1051_v59 }
 0x26d   : > { %v1146_v1 = vmul.f32 1.442695, %v1114_v0 }
 0x26e   : > { %v1053_v2 = vpop.xlane.xlu0 %1052 }
 0x26f   : > { %1663 = vpow2.f32 %v1146_v1  ;;  %v1115_v3 = vsub.f32 %v2055_v37, %v1053_v2 }
 0x271   : > { %v1148_v4 = vmul.f32 1.442695, %v1115_v3 }
 0x272   : > { %v1055_v7 = vpop.xlane.xlu1 %1054 }
 0x273   : > { %1665 = vpow2.f32 %v1148_v4  ;;  %v1116_v10 = vsub.f32 %v2059_v43, %v1055_v7 }
 0x275   : > { %v1150_v11 = vmul.f32 1.442695, %v1116_v10 }
 0x276   : > { %v1057_v12 = vpop.xlane.xlu1 %1056 }
 0x277   : > { %1667 = vpow2.f32 %v1150_v11  ;;  %v1117_v32 = vsub.f32 %v2063_v45, %v1057_v12 }
 0x279   : > { %v2182_v15 = vpop.eup %1663  ;;  %v1152_v16 = vmul.f32 1.442695, %v1117_v32 }
 0x27a   : > { %1210 = vadd.xlane.f32.xlu0 %v2182_v15  ;;  %v1059_v55 = vpop.xlane.xlu0 %1058 }
 0x27b   : > { %1669 = vpow2.f32 %v1152_v16  ;;  %v1118_v17 = vsub.f32 %v2067_v51, %v1059_v55 }
 0x27c   : > { %v1061_v37 = vpop.xlane.xlu1 %1060 }
 0x27d   : > { %v2186_v20 = vpop.eup %1665  ;;  %v1154_v23 = vmul.f32 1.442695, %v1118_v17  ;;  %v1119_v43 = vsub.f32 %v2071_v52, %v1061_v37 }
 0x27e   : > { %1212 = vadd.xlane.f32.xlu1 %v2186_v20 }
 0x27f   : > { %1671 = vpow2.f32 %v1154_v23  ;;  %v1156_v24 = vmul.f32 1.442695, %v1119_v43 }
 0x281   : > { %v2190_v45 = vpop.eup %1667  ;;  %1673 = vpow2.f32 %v1156_v24 }
 0x282   : > { %1214 = vadd.xlane.f32.xlu0 %v2190_v45  ;;  %v1063_v25 = vpop.xlane.xlu0 %1062 }
 0x283   : > { %v1120_v26 = vsub.f32 %v2075_v61, %v1063_v25 }
 0x284   : > { %v1065_v27 = vpop.xlane.xlu1 %1064 }
 0x285   : > { %v2194_v51 = vpop.eup %1669  ;;  %v1158_v54 = vmul.f32 1.442695, %v1120_v26  ;;  %v1121_v33 = vsub.f32 %v2079_v62, %v1065_v27 }
 0x286   : > { %1216 = vadd.xlane.f32.xlu1 %v2194_v51 }
 0x287   : > { %1675 = vpow2.f32 %v1158_v54  ;;  %v1160_v52 = vmul.f32 1.442695, %v1121_v33 }
 0x289   : > { %v2198_v34 = vpop.eup %1671  ;;  %1677 = vpow2.f32 %v1160_v52 }
 0x28a   : > { %1218 = vadd.xlane.f32.xlu0 %v2198_v34  ;;  %v1067_v35 = vpop.xlane.xlu0 %1066 }
 0x28b   : > { %v2201_v36 = vpop.eup %1673  ;;  %v1122_v61 = vsub.f32 %v2083_v5, %v1067_v35 }
 0x28c   : > { %v1069_v40 = vpop.xlane.xlu1 %1068  ;;  %1220 = vadd.xlane.f32.xlu1 %v2201_v36 }
 0x28d   : > { %v1162_v44 = vmul.f32 1.442695, %v1122_v61  ;;  %v1123_v62 = vsub.f32 %v2087_v6, %v1069_v40 }
 0x28f   : > { %1679 = vpow2.f32 %v1162_v44  ;;  %v1164_v46 = vmul.f32 1.442695, %v1123_v62 }
 0x291   : > { %v2206_v47 = vpop.eup %1675  ;;  %1681 = vpow2.f32 %v1164_v46 }
 0x292   : > { %1222 = vadd.xlane.f32.xlu0 %v2206_v47  ;;  %v1071_v50 = vpop.xlane.xlu0 %1070 }
 0x293   : > { %v2209_v53 = vpop.eup %1677  ;;  %v1124_v56 = vsub.f32 %v2091_v13, %v1071_v50 }
 0x294   : > { %v1073_v59 = vpop.xlane.xlu1 %1072  ;;  %1224 = vadd.xlane.f32.xlu1 %v2209_v53 }
 0x295   : > { %v1166_v5 = vmul.f32 1.442695, %v1124_v56  ;;  %v1125_v0 = vsub.f32 %v2095_v14, %v1073_v59 }
 0x297   : > { %1683 = vpow2.f32 %v1166_v5  ;;  %v1168_v6 = vmul.f32 1.442695, %v1125_v0 }
 0x299   : > { %v2214_v1 = vpop.eup %1679  ;;  %1685 = vpow2.f32 %v1168_v6 }
 0x29a   : > { %1226 = vadd.xlane.f32.xlu0 %v2214_v1  ;;  %v1075_v2 = vpop.xlane.xlu0 %1074 }
 0x29b   : > { %v2217_v3 = vpop.eup %1681  ;;  %v1126_v4 = vsub.f32 %v2099_v21, %v1075_v2 }
 0x29c   : > { %v1077_v7 = vpop.xlane.xlu1 %1076  ;;  %1228 = vadd.xlane.f32.xlu1 %v2217_v3 }
 0x29d   : > { %v1170_v13 = vmul.f32 1.442695, %v1126_v4  ;;  %v1127_v10 = vsub.f32 %v2103_v22, %v1077_v7 }
 0x29f   : > { %1687 = vpow2.f32 %v1170_v13  ;;  %v1172_v14 = vmul.f32 1.442695, %v1127_v10 }
 0x2a1   : > { %v2222_v11 = vpop.eup %1683  ;;  %1689 = vpow2.f32 %v1172_v14 }
 0x2a2   : > { %1230 = vadd.xlane.f32.xlu0 %v2222_v11  ;;  %v1079_v12 = vpop.xlane.xlu0 %1078 }
 0x2a3   : > { %v2225_v32 = vpop.eup %1685  ;;  %v1128_v16 = vsub.f32 %v2107_v29, %v1079_v12 }
 0x2a4   : > { %v1081_v55 = vpop.xlane.xlu1 %1080  ;;  %1232 = vadd.xlane.f32.xlu1 %v2225_v32 }
 0x2a5   : > { %v1174_v21 = vmul.f32 1.442695, %v1128_v16  ;;  %v1129_v17 = vsub.f32 %v2111_v30, %v1081_v55 }
 0x2a7   : > { %1691 = vpow2.f32 %v1174_v21  ;;  %v1176_v22 = vmul.f32 1.442695, %v1129_v17 }
 0x2a9   : > { %v2230_v37 = vpop.eup %1687  ;;  %1693 = vpow2.f32 %v1176_v22 }
 0x2aa   : > { %1234 = vadd.xlane.f32.xlu0 %v2230_v37  ;;  %v1083_v23 = vpop.xlane.xlu0 %1082 }
 0x2ab   : > { %v2233_v43 = vpop.eup %1689  ;;  %v1130_v24 = vsub.f32 %v2115_v38, %v1083_v23 }
 0x2ac   : > { %v1085_v25 = vpop.xlane.xlu1 %1084  ;;  %1236 = vadd.xlane.f32.xlu1 %v2233_v43 }
 0x2ad   : > { %v1178_v29 = vmul.f32 1.442695, %v1130_v24  ;;  %v1131_v26 = vsub.f32 %v2119_v39, %v1085_v25 }
 0x2af   : > { %1695 = vpow2.f32 %v1178_v29  ;;  %v1180_v30 = vmul.f32 1.442695, %v1131_v26 }
 0x2b1   : > { %v2238_v27 = vpop.eup %1691  ;;  %1697 = vpow2.f32 %v1180_v30 }
 0x2b2   : > { %1238 = vadd.xlane.f32.xlu0 %v2238_v27  ;;  %v1087_v54 = vpop.xlane.xlu0 %1086 }
 0x2b3   : > { %v2241_v33 = vpop.eup %1693  ;;  %v1132_v52 = vsub.f32 %v2123_v48, %v1087_v54 }
 0x2b4   : > { %v1089_v35 = vpop.xlane.xlu1 %1088  ;;  %1240 = vadd.xlane.f32.xlu1 %v2241_v33 }
 0x2b5   : > { %v1182_v38 = vmul.f32 1.442695, %v1132_v52  ;;  %v1133_v61 = vsub.f32 %v2127_v49, %v1089_v35 }
 0x2b7   : > { %1699 = vpow2.f32 %v1182_v38  ;;  %v1184_v39 = vmul.f32 1.442695, %v1133_v61 }
 0x2b9   : > { %v2246_v40 = vpop.eup %1695  ;;  %1701 = vpow2.f32 %v1184_v39 }
 0x2ba   : > { %1242 = vadd.xlane.f32.xlu0 %v2246_v40  ;;  %v1091_v44 = vpop.xlane.xlu0 %1090 }
 0x2bb   : > { %v2249_v62 = vpop.eup %1697  ;;  %v1134_v46 = vsub.f32 %v2131_v60, %v1091_v44 }
 0x2bc   : > { %v1093_v50 = vpop.xlane.xlu1 %1092  ;;  %1244 = vadd.xlane.f32.xlu1 %v2249_v62 }
 0x2bd   : > { %v1186_v48 = vmul.f32 1.442695, %v1134_v46  ;;  %v1135_v56 = vsub.f32 %v2135_v63, %v1093_v50 }
 0x2bf   : > { %1703 = vpow2.f32 %v1186_v48  ;;  %v1188_v49 = vmul.f32 1.442695, %v1135_v56 }
 0x2c1   : > { %v2254_v59 = vpop.eup %1699  ;;  %1705 = vpow2.f32 %v1188_v49 }
 0x2c2   : > { %1246 = vadd.xlane.f32.xlu0 %v2254_v59  ;;  %v1095_v5 = vpop.xlane.xlu0 %1094 }
 0x2c3   : > { %v2257_v0 = vpop.eup %1701  ;;  %v1136_v6 = vsub.f32 %v2139_v8, %v1095_v5 }
 0x2c4   : > { %v1097_v2 = vpop.xlane.xlu1 %1096  ;;  %1248 = vadd.xlane.f32.xlu1 %v2257_v0 }
 0x2c5   : > { %v1190_v60 = vmul.f32 1.442695, %v1136_v6  ;;  %v1137_v4 = vsub.f32 %v2143_v9, %v1097_v2 }
 0x2c7   : > { %1707 = vpow2.f32 %v1190_v60  ;;  %v1192_v63 = vmul.f32 1.442695, %v1137_v4 }
 0x2c9   : > { %v2262_v7 = vpop.eup %1703  ;;  %1709 = vpow2.f32 %v1192_v63 }
 0x2ca   : > { %1250 = vadd.xlane.f32.xlu0 %v2262_v7  ;;  %v1099_v13 = vpop.xlane.xlu0 %1098 }
 0x2cb   : > { %v2265_v10 = vpop.eup %1705  ;;  %v1138_v14 = vsub.f32 %v2147_v18, %v1099_v13 }
 0x2cc   : > { %v1101_v12 = vpop.xlane.xlu1 %1100  ;;  %1252 = vadd.xlane.f32.xlu1 %v2265_v10 }
 0x2cd   : > { %v1194_v8 = vmul.f32 1.442695, %v1138_v14  ;;  %v1139_v16 = vsub.f32 %v2151_v19, %v1101_v12 }
 0x2cf   : > { %1711 = vpow2.f32 %v1194_v8  ;;  %v1196_v9 = vmul.f32 1.442695, %v1139_v16 }
 0x2d1   : > { %v2270_v55 = vpop.eup %1707  ;;  %1713 = vpow2.f32 %v1196_v9 }
 0x2d2   : > { %1254 = vadd.xlane.f32.xlu0 %v2270_v55  ;;  %v1103_v21 = vpop.xlane.xlu0 %1102 }
 0x2d3   : > { %v2273_v17 = vpop.eup %1709  ;;  %v1140_v22 = vsub.f32 %v2155_v28, %v1103_v21 }
 0x2d4   : > { %v1105_v23 = vpop.xlane.xlu1 %1104  ;;  %1256 = vadd.xlane.f32.xlu1 %v2273_v17 }
 0x2d5   : > { %v1198_v18 = vmul.f32 1.442695, %v1140_v22  ;;  %v1141_v24 = vsub.f32 %v2159_v31, %v1105_v23 }
 0x2d7   : > { %1715 = vpow2.f32 %v1198_v18  ;;  %v1200_v19 = vmul.f32 1.442695, %v1141_v24 }
 0x2d9   : > { %v2278_v25 = vpop.eup %1711  ;;  %1717 = vpow2.f32 %v1200_v19 }
 0x2da   : > { %1258 = vadd.xlane.f32.xlu0 %v2278_v25  ;;  %v1107_v29 = vpop.xlane.xlu0 %1106 }
 0x2db   : > { %v2281_v26 = vpop.eup %1713  ;;  %v1142_v30 = vsub.f32 %v2163_v41, %v1107_v29 }
 0x2dc   : > { %v1109_v54 = vpop.xlane.xlu1 %1108  ;;  %1260 = vadd.xlane.f32.xlu1 %v2281_v26 }
 0x2dd   : > { %v1202_v28 = vmul.f32 1.442695, %v1142_v30  ;;  %v1143_v52 = vsub.f32 %v2167_v42, %v1109_v54 }
 0x2df   : > { %1719 = vpow2.f32 %v1202_v28  ;;  %v1204_v31 = vmul.f32 1.442695, %v1143_v52 }
 0x2e1   : > { %v2286_v35 = vpop.eup %1715  ;;  %1721 = vpow2.f32 %v1204_v31 }
 0x2e2   : > { %1262 = vadd.xlane.f32.xlu0 %v2286_v35  ;;  %v1111_v38 = vpop.xlane.xlu0 %1110 }
 0x2e3   : > { %v2289_v61 = vpop.eup %1717  ;;  %v1144_v39 = vsub.f32 %v2171_v57, %v1111_v38 }
 0x2e4   : > { %v1113_v44 = vpop.xlane.xlu1 %1112  ;;  %1264 = vadd.xlane.f32.xlu1 %v2289_v61 }
 0x2e5   : > { %v1206_v41 = vmul.f32 1.442695, %v1144_v39  ;;  %v1145_v46 = vsub.f32 %v2175_v58, %v1113_v44 }
 0x2e7   : > { %1723 = vpow2.f32 %v1206_v41  ;;  %v1208_v42 = vmul.f32 1.442695, %v1145_v46 }
 0x2e9   : > { %v2294_v50 = vpop.eup %1719  ;;  %1725 = vpow2.f32 %v1208_v42 }
 0x2ea   : > { %1266 = vadd.xlane.f32.xlu0 %v2294_v50 }
 0x2eb   : > { %v2297_v48 = vpop.eup %1721 }
 0x2ec   : > { %1268 = vadd.xlane.f32.xlu1 %v2297_v48 }
 0x2f1   : > { %v2300_v56 = vpop.eup %1723 }
 0x2f2   : > { %1270 = vadd.xlane.f32.xlu0 %v2300_v56 }
 0x2f3   : > { %v2303_v57 = vpop.eup %1725 }
 0x2f4   : > { %1272 = vadd.xlane.f32.xlu1 %v2303_v57 }
 0x307   : > { %v1211_v58 = vpop.xlane.xlu0 %1210 }
 0x308   : > { %1727 = vrcp.f32 %v1211_v58 }
 0x30b   : > { %v1213_v49 = vpop.xlane.xlu1 %1212 }
 0x30c   : > { %1729 = vrcp.f32 %v1213_v49 }
 0x30f   : > { %v1215_v5 = vpop.xlane.xlu0 %1214 }
 0x310   : > { %1731 = vrcp.f32 %v1215_v5 }
 0x312   : > { %v1728_v6 = vpop.eup %1727 }
 0x313   : > { %v1306_v2 = vmul.f32 %v1728_v6, %v2182_v15  ;;  %v1217_v60 = vpop.xlane.xlu1 %1216 }
 0x314   : > { %1733 = vrcp.f32 %v1217_v60 }
 0x315   : > { %1338 = vst [vmem:[%s2310_s28] sm:$0xff] %v1306_v2 }
 0x316   : > { %v1730_v4 = vpop.eup %1729 }
 0x317   : > { %v1307_v63 = vmul.f32 %v1730_v4, %v2186_v20  ;;  %v1219_v13 = vpop.xlane.xlu0 %1218 }
 0x318   : > { %1735 = vrcp.f32 %v1219_v13 }
 0x319   : > { %1339 = vst [vmem:[%s2310_s28 + $0x8] sm:$0xff] %v1307_v63  ;;  %v1221_v14 = vpop.xlane.xlu1 %1220 }
 0x31a   : > { %v1732_v12 = vpop.eup %1731  ;;  %1737 = vrcp.f32 %v1221_v14 }
 0x31b   : > { %v1308_v8 = vmul.f32 %v1732_v12, %v2190_v45 }
 0x31d   : > { %1340 = vst [vmem:[%s2310_s28 + $0x10] sm:$0xff] %v1308_v8 }
 0x31e   : > { %v1734_v16 = vpop.eup %1733 }
 0x31f   : > { %v1309_v15 = vmul.f32 %v1734_v16, %v2194_v51  ;;  %v1223_v9 = vpop.xlane.xlu0 %1222 }
 0x320   : > { %1739 = vrcp.f32 %v1223_v9 }
 0x321   : > { %1341 = vst [vmem:[%s2310_s28 + $0x18] sm:$0xff] %v1309_v15  ;;  %v1225_v21 = vpop.xlane.xlu1 %1224 }
 0x322   : > { %v1736_v20 = vpop.eup %1735  ;;  %1741 = vrcp.f32 %v1225_v21 }
 0x323   : > { %v1310_v22 = vmul.f32 %v1736_v20, %v2198_v34 }
 0x324   : > { %v1738_v23 = vpop.eup %1737 }
 0x325   : > { %1342 = vst [vmem:[%s2310_s28 + $0x20] sm:$0xff] %v1310_v22  ;;  %v1311_v18 = vmul.f32 %v1738_v23, %v2201_v36 }
 0x327   : > { %1343 = vst [vmem:[%s2310_s28 + $0x28] sm:$0xff] %v1311_v18  ;;  %v1227_v45 = vpop.xlane.xlu0 %1226 }
 0x328   : > { %1743 = vrcp.f32 %v1227_v45 }
 0x329   : > { %v1229_v24 = vpop.xlane.xlu1 %1228 }
 0x32a   : > { %v1740_v51 = vpop.eup %1739  ;;  %1745 = vrcp.f32 %v1229_v24 }
 0x32b   : > { %v1312_v19 = vmul.f32 %v1740_v51, %v2206_v47 }
 0x32c   : > { %v1742_v29 = vpop.eup %1741 }
 0x32d   : > { %1344 = vst [vmem:[%s2310_s28 + $0x30] sm:$0xff] %v1312_v19  ;;  %v1313_v30 = vmul.f32 %v1742_v29, %v2209_v53 }
 0x32f   : > { %1345 = vst [vmem:[%s2310_s28 + $0x38] sm:$0xff] %v1313_v30  ;;  %v1231_v34 = vpop.xlane.xlu0 %1230 }
 0x330   : > { %1747 = vrcp.f32 %v1231_v34 }
 0x331   : > { %v1233_v54 = vpop.xlane.xlu1 %1232 }
 0x332   : > { %v1744_v36 = vpop.eup %1743  ;;  %1749 = vrcp.f32 %v1233_v54 }
 0x333   : > { %v1314_v28 = vmul.f32 %v1744_v36, %v2214_v1 }
 0x334   : > { %v1746_v52 = vpop.eup %1745 }
 0x335   : > { %1346 = vst [vmem:[%s2310_s28 + $0x40] sm:$0xff] %v1314_v28  ;;  %v1315_v31 = vmul.f32 %v1746_v52, %v2217_v3 }
 0x337   : > { %1347 = vst [vmem:[%s2310_s28 + $0x48] sm:$0xff] %v1315_v31  ;;  %v1235_v47 = vpop.xlane.xlu0 %1234 }
 0x338   : > { %1751 = vrcp.f32 %v1235_v47 }
 0x339   : > { %v1237_v38 = vpop.xlane.xlu1 %1236 }
 0x33a   : > { %v1748_v53 = vpop.eup %1747  ;;  %1753 = vrcp.f32 %v1237_v38 }
 0x33b   : > { %v1316_v39 = vmul.f32 %v1748_v53, %v2222_v11 }
 0x33c   : > { %v1750_v44 = vpop.eup %1749 }
 0x33d   : > { %1348 = vst [vmem:[%s2310_s28 + $0x50] sm:$0xff] %v1316_v39  ;;  %v1317_v41 = vmul.f32 %v1750_v44, %v2225_v32 }
 0x33f   : > { %1349 = vst [vmem:[%s2310_s28 + $0x58] sm:$0xff] %v1317_v41  ;;  %v1239_v1 = vpop.xlane.xlu0 %1238 }
 0x340   : > { %1755 = vrcp.f32 %v1239_v1 }
 0x341   : > { %v1241_v46 = vpop.xlane.xlu1 %1240 }
 0x342   : > { %v1752_v3 = vpop.eup %1751  ;;  %1757 = vrcp.f32 %v1241_v46 }
 0x343   : > { %v1318_v42 = vmul.f32 %v1752_v3, %v2230_v37 }
 0x344   : > { %v1754_v58 = vpop.eup %1753 }
 0x345   : > { %1350 = vst [vmem:[%s2310_s28 + $0x60] sm:$0xff] %v1318_v42  ;;  %v1319_v49 = vmul.f32 %v1754_v58, %v2233_v43 }
 0x347   : > { %1351 = vst [vmem:[%s2310_s28 + $0x68] sm:$0xff] %v1319_v49  ;;  %v1243_v11 = vpop.xlane.xlu0 %1242 }
 0x348   : > { %1759 = vrcp.f32 %v1243_v11 }
 0x349   : > { %v1245_v5 = vpop.xlane.xlu1 %1244 }
 0x34a   : > { %v1756_v32 = vpop.eup %1755  ;;  %1761 = vrcp.f32 %v1245_v5 }
 0x34b   : > { %v1320_v6 = vmul.f32 %v1756_v32, %v2238_v27 }
 0x34c   : > { %v1758_v2 = vpop.eup %1757 }
 0x34d   : > { %1352 = vst [vmem:[%s2310_s28 + $0x70] sm:$0xff] %v1320_v6  ;;  %v1321_v60 = vmul.f32 %v1758_v2, %v2241_v33 }
 0x34f   : > { %1353 = vst [vmem:[%s2310_s28 + $0x78] sm:$0xff] %v1321_v60  ;;  %v1247_v37 = vpop.xlane.xlu0 %1246 }
 0x350   : > { %1763 = vrcp.f32 %v1247_v37 }
 0x351   : > { %v1249_v4 = vpop.xlane.xlu1 %1248 }
 0x352   : > { %v1760_v43 = vpop.eup %1759  ;;  %1765 = vrcp.f32 %v1249_v4 }
 0x353   : > { %v1322_v63 = vmul.f32 %v1760_v43, %v2246_v40 }
 0x354   : > { %v1762_v13 = vpop.eup %1761 }
 0x355   : > { %1354 = vst [vmem:[%s2310_s28 + $0x80] sm:$0xff] %v1322_v63  ;;  %v1323_v14 = vmul.f32 %v1762_v13, %v2249_v62 }
 0x357   : > { %1355 = vst [vmem:[%s2310_s28 + $0x88] sm:$0xff] %v1323_v14  ;;  %v1251_v27 = vpop.xlane.xlu0 %1250 }
 0x358   : > { %1767 = vrcp.f32 %v1251_v27 }
 0x359   : > { %v1253_v12 = vpop.xlane.xlu1 %1252 }
 0x35a   : > { %v1764_v33 = vpop.eup %1763  ;;  %1769 = vrcp.f32 %v1253_v12 }
 0x35b   : > { %v1324_v8 = vmul.f32 %v1764_v33, %v2254_v59 }
 0x35c   : > { %v1766_v16 = vpop.eup %1765 }
 0x35d   : > { %1356 = vst [vmem:[%s2310_s28 + $0x90] sm:$0xff] %v1324_v8  ;;  %v1325_v15 = vmul.f32 %v1766_v16, %v2257_v0 }
 0x35f   : > { %1357 = vst [vmem:[%s2310_s28 + $0x98] sm:$0xff] %v1325_v15  ;;  %v1255_v40 = vpop.xlane.xlu0 %1254 }
 0x360   : > { %1771 = vrcp.f32 %v1255_v40 }
 0x361   : > { %v1257_v9 = vpop.xlane.xlu1 %1256 }
 0x362   : > { %v1768_v62 = vpop.eup %1767  ;;  %1773 = vrcp.f32 %v1257_v9 }
 0x363   : > { %v1326_v21 = vmul.f32 %v1768_v62, %v2262_v7 }
 0x364   : > { %v1770_v20 = vpop.eup %1769 }
 0x365   : > { %1358 = vst [vmem:[%s2310_s28 + $0xa0] sm:$0xff] %v1326_v21  ;;  %v1327_v22 = vmul.f32 %v1770_v20, %v2265_v10 }
 0x367   : > { %1359 = vst [vmem:[%s2310_s28 + $0xa8] sm:$0xff] %v1327_v22  ;;  %v1259_v59 = vpop.xlane.xlu0 %1258 }
 0x368   : > { %1775 = vrcp.f32 %v1259_v59 }
 0x369   : > { %v1261_v23 = vpop.xlane.xlu1 %1260 }
 0x36a   : > { %v1772_v0 = vpop.eup %1771  ;;  %1777 = vrcp.f32 %v1261_v23 }
 0x36b   : > { %v1328_v18 = vmul.f32 %v1772_v0, %v2270_v55 }
 0x36c   : > { %v1774_v45 = vpop.eup %1773 }
 0x36d   : > { %1360 = vst [vmem:[%s2310_s28 + $0xb0] sm:$0xff] %v1328_v18  ;;  %v1329_v24 = vmul.f32 %v1774_v45, %v2273_v17 }
 0x36f   : > { %1361 = vst [vmem:[%s2310_s28 + $0xb8] sm:$0xff] %v1329_v24  ;;  %v1263_v7 = vpop.xlane.xlu0 %1262 }
 0x370   : > { %1779 = vrcp.f32 %v1263_v7 }
 0x371   : > { %v1265_v51 = vpop.xlane.xlu1 %1264 }
 0x372   : > { %v1776_v10 = vpop.eup %1775  ;;  %1781 = vrcp.f32 %v1265_v51 }
 0x373   : > { %v1330_v19 = vmul.f32 %v1776_v10, %v2278_v25 }
 0x374   : > { %v1778_v29 = vpop.eup %1777 }
 0x375   : > { %1362 = vst [vmem:[%s2310_s28 + $0xc0] sm:$0xff] %v1330_v19  ;;  %v1331_v30 = vmul.f32 %v1778_v29, %v2281_v26 }
 0x377   : > { %1363 = vst [vmem:[%s2310_s28 + $0xc8] sm:$0xff] %v1331_v30  ;;  %v1267_v55 = vpop.xlane.xlu0 %1266 }
 0x378   : > { %1783 = vrcp.f32 %v1267_v55 }
 0x379   : > { %v1269_v34 = vpop.xlane.xlu1 %1268 }
 0x37a   : > { %v1780_v17 = vpop.eup %1779  ;;  %1785 = vrcp.f32 %v1269_v34 }
 0x37b   : > { %v1332_v54 = vmul.f32 %v1780_v17, %v2286_v35 }
 0x37c   : > { %v1782_v36 = vpop.eup %1781 }
 0x37d   : > { %1364 = vst [vmem:[%s2310_s28 + $0xd0] sm:$0xff] %v1332_v54  ;;  %v1333_v28 = vmul.f32 %v1782_v36, %v2289_v61 }
 0x37f   : > { %1365 = vst [vmem:[%s2310_s28 + $0xd8] sm:$0xff] %v1333_v28  ;;  %v1271_v25 = vpop.xlane.xlu0 %1270 }
 0x380   : > { %1787 = vrcp.f32 %v1271_v25 }
 0x381   : > { %v1273_v26 = vpop.xlane.xlu1 %1272 }
 0x382   : > { %v1784_v52 = vpop.eup %1783  ;;  %1789 = vrcp.f32 %v1273_v26 }
 0x383   : > { %v1334_v31 = vmul.f32 %v1784_v52, %v2294_v50 }
 0x384   : > { %v1786_v47 = vpop.eup %1785 }
 0x385   : > { %1366 = vst [vmem:[%s2310_s28 + $0xe0] sm:$0xff] %v1334_v31  ;;  %v1335_v38 = vmul.f32 %v1786_v47, %v2297_v48 }
 0x387   : > { %1367 = vst [vmem:[%s2310_s28 + $0xe8] sm:$0xff] %v1335_v38 }
 0x38a   : > { %v1788_v35 = vpop.eup %1787 }
 0x38b   : > { %v1336_v53 = vmul.f32 %v1788_v35, %v2300_v56 }
 0x38c   : > { %v1790_v39 = vpop.eup %1789 }
 0x38d   : > { %1368 = vst [vmem:[%s2310_s28 + $0xf0] sm:$0xff] %v1336_v53  ;;  %v1337_v61 = vmul.f32 %v1790_v39, %v2303_v57 }
 0x38f   : > { %1369 = vst [vmem:[%s2310_s28 + $0xf8] sm:$0xff] %v1337_v61 }
 0x390 PF: > { %s15_s18 = sadd.s32 1, %s1797_s18  }
 0x391   : > { %p12_p4 = scmp.ge.s32.totalorder %s15_s18, 4  }
 0x393   :  { %14 = sbr.rel (!%p12_p4) target bundleno = 1 (0x1), region = 70 }

</bundles_post_ra>
